<compile_context>
chip_gen: v7x
topology: tpu7x:2x2x1
jax: 0.10.0
libtpu: 0.0.40
codegen_flags: <defaults>
</compile_context>

<pallas_src>
from functools import partial

import jax
import jax.numpy as jnp
from jax.experimental import pallas as pl
from jax.experimental.pallas import tpu as pltpu

_OUT_PAD = 128    # lane-dense padded output width (real targets live in the first T columns)
_SUBLANE = 16     # row quantum (bf16 packs 16 rows per vreg sublane group)
_TB_MAX = 4096    # per-step row-tile cap: comfortably inside v5e's 16 MiB scoped-VMEM default


def _round_up(x, m):
    return ((x + m - 1) // m) * m


def _model_kernel(enc_ref, w1_ref, b1_ref, wh_ref, bh_ref, out_ref):
    """MLP head on the pre-pooled encoder features.

    enc_ref : [TB, C]   bf16  sum of all per-column encodings (pool scale folded into w1)
    w1_ref  : [C, H]    bf16  hidden_layer weight, pre-scaled by 1/num_cols (resident)
    b1_ref  : [1, H]    f32   hidden_layer bias (resident)
    wh_ref  : [H, 128]  bf16  stacked output-head weights, lane-padded (resident)
    bh_ref  : [1, 128]  f32   stacked output-head biases, lane-padded (resident)
    out_ref : [TB, 128] bf16  lane-dense output tile (unmasked vst)
    """
    # dropout(0.1) is identity at inference (eval mode).
    # TODO(synk): training-mode stochastic dropout (pltpu.prng_*) not implemented.
    hidden = jnp.dot(enc_ref[...], w1_ref[...],
                     preferred_element_type=jnp.float32) + b1_ref[...]     # [TB, H] f32
    hidden = jnp.maximum(hidden, 0.0)
    out = jnp.dot(hidden.astype(jnp.bfloat16), wh_ref[...],
                  preferred_element_type=jnp.float32) + bh_ref[...]        # [TB, 128] f32
    out_ref[...] = out.astype(jnp.bfloat16)


@partial(jax.jit, static_argnames=("n_targets",))
def _forward_core(x_num, x_cat_idx, w_num, bias_const, w1, b1, wh_pad, bh_pad,
                  emb_table, emb_offsets, *, n_targets):
    B = x_num.shape[0]
    C = w_num.shape[1]
    H = w1.shape[1]
    out_pad = wh_pad.shape[1]

    # ---- XLA glue (all f32; fused by XLA) ----------------------------------
    # Numerical LinearEncoder with (x - mean)/std folded into the weights (f32, so no
    # bf16 quantization of raw x_num interacts with the normalization fold).
    num_contrib = x_num @ w_num + bias_const                        # [B, C]
    # Categorical EmbeddingEncoder: gather + per-row column sum; the [B, N_cat, C]
    # intermediate never round-trips through HBM into the kernel.
    # (jnp.take clips out-of-range indices instead of raising, unlike nn.Embedding.)
    idx = x_cat_idx + emb_offsets[None, :]                          # [B, N_cat]
    gathered = jnp.take(emb_table, idx.reshape(-1), axis=0)         # [B*N_cat, C]
    cat_sum = gathered.reshape(B, -1, C).sum(axis=1)                # [B, C]
    # Combined per-row encoder sum; bf16 halves the kernel's input HBM stream.
    enc_sum = (num_contrib + cat_sum).astype(jnp.bfloat16)          # [B, C]

    # ---- generation-aware batch tiling --------------------------------------
    TB = min(_TB_MAX, _round_up(B, _SUBLANE))
    if B > _SUBLANE and _round_up(B, TB) // TB < 2:
        # Guarantee >=2 grid steps so the "parallel" axis can feed both v7x TensorCores.
        TB = _round_up((B + 1) // 2, _SUBLANE)
    B_pad = _round_up(B, TB)
    if B_pad != B:
        enc_sum = jnp.pad(enc_sum, ((0, B_pad - B), (0, 0)))

    out = pl.pallas_call(
        _model_kernel,
        out_shape=jax.ShapeDtypeStruct((B_pad, out_pad), jnp.bfloat16),
        grid=(B_pad // TB,),
        in_specs=[
            pl.BlockSpec((TB, C), lambda i: (i, 0)),            # enc_sum (batch-tiled)
            pl.BlockSpec((C, H), lambda i: (0, 0)),             # w1 (resident)
            pl.BlockSpec((1, H), lambda i: (0, 0)),             # b1 (resident)
            pl.BlockSpec((H, out_pad), lambda i: (0, 0)),       # wh_pad (resident)
            pl.BlockSpec((1, out_pad), lambda i: (0, 0)),       # bh_pad (resident)
        ],
        out_specs=pl.BlockSpec((TB, out_pad), lambda i: (i, 0)),
        compiler_params=pltpu.CompilerParams(
            dimension_semantics=("parallel",),   # shard batch tiles across TCs (v7x)
        ),
    )(enc_sum, w1, b1, wh_pad, bh_pad)

    # Single contiguous narrow slice (avoid T strided column slices of the padded
    # [B_pad, 128] array); cast the tiny result back to f32 to match the torch API.
    return out[:B, :n_targets].astype(jnp.float32)                 # [B, T]


def prepare_params(params):
    """One-time preprocessing: fold normalization + mean-pool scale into weights,
    pad/stack the output heads, concatenate the embedding tables."""
    std = jnp.maximum(params["num_std"], 1e-6)                    # guard constant columns
    inv_std = 1.0 / std                                           # [1, N_num]
    w_num_folded = params["w_num"] * inv_std.T                    # [N_num, C]
    bias_const = (jnp.sum(params["b_num"], axis=0, keepdims=True)
                  - (params["num_mean"] * inv_std) @ params["w_num"])    # [1, C]

    n_num = params["w_num"].shape[0]
    n_cat = len(params["emb_tables"])
    inv_ncols = 1.0 / float(n_num + n_cat)

    # Fold x.mean(dim=1) scale into the hidden layer; bf16 for native MXU operands.
    w1_scaled = (params["w1"] * inv_ncols).astype(jnp.bfloat16)   # [C, H]

    H, T = params["wh"].shape
    wh_pad = (jnp.zeros((H, _OUT_PAD), jnp.float32)
              .at[:, :T].set(params["wh"]).astype(jnp.bfloat16))
    bh_pad = jnp.zeros((1, _OUT_PAD), jnp.float32).at[:, :T].set(params["bh"])

    emb_table = jnp.concatenate(params["emb_tables"], axis=0)     # [sum(vocab), C]
    sizes = jnp.array([t.shape[0] for t in params["emb_tables"]], jnp.int32)
    emb_offsets = jnp.concatenate(
        [jnp.zeros((1,), jnp.int32), jnp.cumsum(sizes)[:-1]])     # [N_cat]

    return {
        "w_num": w_num_folded, "bias_const": bias_const,
        "w1": w1_scaled, "b1": params["b1"],
        "wh_pad": wh_pad, "bh_pad": bh_pad,
        "emb_table": emb_table, "emb_offsets": emb_offsets,
    }


def binary_classification_forward(x_num, x_cat_idx, prep, target_names):
    """Runs the Pallas kernel. Returns dict {target_name: [B, 1]}."""
    out = _forward_core(
        x_num, x_cat_idx,
        prep["w_num"], prep["bias_const"], prep["w1"], prep["b1"],
        prep["wh_pad"], prep["bh_pad"], prep["emb_table"], prep["emb_offsets"],
        n_targets=len(target_names),
    )
    return {name: out[:, i:i + 1] for i, name in enumerate(target_names)}


def init_params(key, channels, n_num, cat_vocab_sizes, n_targets):
    """Deterministic parameter init matching the module's __init__ shapes."""
    H = channels // 2
    ks = jax.random.split(key, 8 + len(cat_vocab_sizes))
    params = {
        # LinearEncoder (numerical): per-column weight/bias [N_num, C]
        "w_num": jax.random.normal(ks[0], (n_num, channels), jnp.float32) * 0.1,
        "b_num": jax.random.normal(ks[1], (n_num, channels), jnp.float32) * 0.01,
        # col_stats normalization constants
        "num_mean": jax.random.normal(ks[2], (1, n_num), jnp.float32) * 0.5,
        "num_std": jnp.ones((1, n_num), jnp.float32) * 1.5,
        # hidden_layer: Linear(C, C//2) stored as [C, H]
        "w1": jax.random.normal(ks[3], (channels, H), jnp.float32) * 0.1,
        "b1": jax.random.normal(ks[4], (1, H), jnp.float32) * 0.01,
        # output heads: len(target_names) x Linear(H, 1) stacked as [H, T]
        "wh": jax.random.normal(ks[5], (H, n_targets), jnp.float32) * 0.1,
        "bh": jax.random.normal(ks[6], (1, n_targets), jnp.float32) * 0.01,
        # EmbeddingEncoder (categorical): one table per column [vocab, C]
        "emb_tables": [
            jax.random.normal(ks[8 + j], (v, channels), jnp.float32) * 0.1
            for j, v in enumerate(cat_vocab_sizes)
        ],
    }
    return params


def _reference_forward(params, x_num, x_cat_idx, target_names):
    """Pure-JAX f32 reference mirroring the PyTorch module (eval mode)."""
    std = jnp.maximum(params["num_std"], 1e-6)
    x_norm = (x_num - params["num_mean"]) / std                              # [B, N_num]
    enc_num = x_norm[:, :, None] * params["w_num"][None] + params["b_num"][None]
    enc_cat = jnp.stack(
        [params["emb_tables"][j][x_cat_idx[:, j]] for j in range(x_cat_idx.shape[1])],
        axis=1)
    x = jnp.concatenate([enc_num, enc_cat], axis=1)                          # [B, cols, C]
    pooled = x.mean(axis=1)
    hidden = jnp.maximum(pooled @ params["w1"] + params["b1"], 0.0)
    out = hidden @ params["wh"] + params["bh"]                               # [B, T]
    return {name: out[:, i:i + 1] for i, name in enumerate(target_names)}


if __name__ == "__main__":
    key = jax.random.PRNGKey(0)
    k_in, k_cat, k_par = jax.random.split(key, 3)

    # Small, forward-consistent shapes
    B = 8
    channels = 32
    n_num = 3
    cat_vocab_sizes = [5, 7]
    target_names = ["target_a", "target_b"]

    params = init_params(k_par, channels, n_num, cat_vocab_sizes, len(target_names))
    prep = prepare_params(params)

    x_num = jax.random.normal(k_in, (B, n_num), jnp.float32)
    x_cat_idx = jnp.stack(
        [jax.random.randint(jax.random.fold_in(k_cat, j), (B,), 0, v)
         for j, v in enumerate(cat_vocab_sizes)],
        axis=1,
    ).astype(jnp.int32)

    outputs = binary_classification_forward(x_num, x_cat_idx, prep, target_names)
    reference = _reference_forward(params, x_num, x_cat_idx, target_names)
    for name in target_names:
        jax.block_until_ready(outputs[name])
        assert outputs[name].shape == (B, 1)
        err = float(jnp.max(jnp.abs(outputs[name] - reference[name])))
        assert err < 5e-2, f"{name}: max abs err {err}"

    print("KERNEL_OK")
</pallas_src>

<mosaic_0001>
module attributes {stable_mosaic.version = 11 : i64} {
  func.func @_model_kernel(%arg0: i32, %arg1: memref<16x32xbf16, #tpu.memory_space<vmem>>, %arg2: memref<32x16xbf16, #tpu.memory_space<vmem>>, %arg3: memref<1x16xf32, #tpu.memory_space<vmem>>, %arg4: memref<16x128xbf16, #tpu.memory_space<vmem>>, %arg5: memref<1x128xf32, #tpu.memory_space<vmem>>, %arg6: memref<16x128xbf16, #tpu.memory_space<vmem>>) attributes {dimension_semantics = [#tpu.dimension_semantics<parallel>], iteration_bounds = array<i64: 1>, scalar_prefetch = 0 : i64, scratch_operands = 0 : i64, tpu.core_type = #tpu.core_type<tc>, window_params = [{transform_indices = @transform_0, window_bounds = array<i64: 16, 32>}, {pipeline_mode = #tpu.pipeline_mode<synchronous>, transform_indices = @transform_1, window_bounds = array<i64: 32, 16>}, {pipeline_mode = #tpu.pipeline_mode<synchronous>, transform_indices = @transform_2, window_bounds = array<i64: 1, 16>}, {pipeline_mode = #tpu.pipeline_mode<synchronous>, transform_indices = @transform_3, window_bounds = array<i64: 16, 128>}, {pipeline_mode = #tpu.pipeline_mode<synchronous>, transform_indices = @transform_4, window_bounds = array<i64: 1, 128>}, {transform_indices = @transform_5, window_bounds = array<i64: 16, 128>}]} {
    %c0 = arith.constant 0 : index
    %c0_0 = arith.constant 0 : index
    %0 = vector.load %arg1[%c0, %c0_0] : memref<16x32xbf16, #tpu.memory_space<vmem>>, vector<16x32xbf16>
    %c0_1 = arith.constant 0 : index
    %c0_2 = arith.constant 0 : index
    %1 = vector.load %arg2[%c0_1, %c0_2] : memref<32x16xbf16, #tpu.memory_space<vmem>>, vector<32x16xbf16>
    %cst = arith.constant dense<0.000000e+00> : vector<16x16xf32>
    %2 = tpu.matmul %0, %1, %cst {dimension_numbers = #tpu.dot_dimension_numbers<[1], [0], [0], [1], [0, 0, 1, 1], [], []>} : vector<16x32xbf16>, vector<32x16xbf16>, vector<16x16xf32> -> vector<16x16xf32>
    %c0_3 = arith.constant 0 : index
    %c0_4 = arith.constant 0 : index
    %3 = vector.load %arg3[%c0_3, %c0_4] : memref<1x16xf32, #tpu.memory_space<vmem>>, vector<1x16xf32>
    %4 = vector.broadcast %3 : vector<1x16xf32> to vector<16x16xf32>
    %5 = arith.addf %2, %4 : vector<16x16xf32>
    %cst_5 = arith.constant 0.000000e+00 : f32
    %6 = vector.broadcast %cst_5 : f32 to vector<16x16xf32>
    %7 = arith.maximumf %5, %6 : vector<16x16xf32>
    %8 = arith.truncf %7 : vector<16x16xf32> to vector<16x16xbf16>
    %c0_6 = arith.constant 0 : index
    %c0_7 = arith.constant 0 : index
    %9 = vector.load %arg4[%c0_6, %c0_7] : memref<16x128xbf16, #tpu.memory_space<vmem>>, vector<16x128xbf16>
    %cst_8 = arith.constant dense<0.000000e+00> : vector<16x128xf32>
    %10 = tpu.matmul %8, %9, %cst_8 {dimension_numbers = #tpu.dot_dimension_numbers<[1], [0], [0], [1], [0, 0, 1, 1], [], []>} : vector<16x16xbf16>, vector<16x128xbf16>, vector<16x128xf32> -> vector<16x128xf32>
    %c0_9 = arith.constant 0 : index
    %c0_10 = arith.constant 0 : index
    %11 = vector.load %arg5[%c0_9, %c0_10] : memref<1x128xf32, #tpu.memory_space<vmem>>, vector<1x128xf32>
    %12 = vector.broadcast %11 : vector<1x128xf32> to vector<16x128xf32>
    %13 = arith.addf %10, %12 : vector<16x128xf32>
    %14 = arith.truncf %13 : vector<16x128xf32> to vector<16x128xbf16>
    %c0_11 = arith.constant 0 : index
    %c0_12 = arith.constant 0 : index
    %15 = vector.load %arg6[%c0_11, %c0_12] : memref<16x128xbf16, #tpu.memory_space<vmem>>, vector<16x128xbf16>
    tpu.vector_store %arg6[%c0_11, %c0_12], %14 {strides = array<i32>} : memref<16x128xbf16, #tpu.memory_space<vmem>>, vector<16x128xbf16>,
    return
  }
  func.func @transform_0(%arg0: i32) -> (i32, i32) {
    %c0_i32 = arith.constant 0 : i32
    %c0_i32_0 = arith.constant 0 : i32
    return %arg0, %c0_i32 : i32, i32
  }
  func.func @transform_1(%arg0: i32) -> (i32, i32) {
    %c0_i32 = arith.constant 0 : i32
    %c0_i32_0 = arith.constant 0 : i32
    %c0_i32_1 = arith.constant 0 : i32
    return %c0_i32, %c0_i32_0 : i32, i32
  }
  func.func @transform_2(%arg0: i32) -> (i32, i32) {
    %c0_i32 = arith.constant 0 : i32
    %c0_i32_0 = arith.constant 0 : i32
    %c0_i32_1 = arith.constant 0 : i32
    return %c0_i32, %c0_i32_0 : i32, i32
  }
  func.func @transform_3(%arg0: i32) -> (i32, i32) {
    %c0_i32 = arith.constant 0 : i32
    %c0_i32_0 = arith.constant 0 : i32
    %c0_i32_1 = arith.constant 0 : i32
    return %c0_i32, %c0_i32_0 : i32, i32
  }
  func.func @transform_4(%arg0: i32) -> (i32, i32) {
    %c0_i32 = arith.constant 0 : i32
    %c0_i32_0 = arith.constant 0 : i32
    %c0_i32_1 = arith.constant 0 : i32
    return %c0_i32, %c0_i32_0 : i32, i32
  }
  func.func @transform_5(%arg0: i32) -> (i32, i32) {
    %c0_i32 = arith.constant 0 : i32
    %c0_i32_0 = arith.constant 0 : i32
    return %arg0, %c0_i32 : i32, i32
  }
}

</mosaic_0001>

<bundles_post_ra>
// kernel: _forward_core.1
= control target key start
LH: loop header
LB: loop body
LE: loop exit
PB: predicated region body
PF: predicated region fallthrough
CT: control target
= control target key end

     0   :  { %v215_v0 = vmov 0.0   ;;  %vm216_vm0 = vmmov 0   ;;  %vm51_vm1 = vcmask 261120   ;;  %vm114_vm2 = vcmask 130048   ;;  %s268_s1 = inlined_call_operand.vmem [shape: bf16[32,16], index: 1, kind: input, shape index: {}]   ;;  %s269_s0 = inlined_call_operand.vmem [shape: bf16[16,32], index: 0, kind: input, shape index: {}]   ;;  %s270_s3 = inlined_call_operand.vmem [shape: bf16[16,128], index: 3, kind: input, shape index: {}]   ;;  %s271_s2 = inlined_call_operand.vmem [shape: f32[1,16], index: 2, kind: input, shape index: {}]   ;;  %s272_s4 = inlined_call_operand.vmem [shape: f32[1,128], index: 4, kind: input, shape index: {}]   ;;  %s273_s5 = inlined_call_operand.vmem [shape: bf16[16,128], index: 5, kind: output, shape index: {}]  }
   0x1   :  { %195 = vmatprep.subr.bf16.mxu0 %v215_v0  ;;  %v211_v1 = vld [vmem:[%s268_s1] sm:$0xff]   ;;  %199 = vmatprep.mubr.msk.bf16.mxu0 %vm216_vm0, %v215_v0  ;;  %v212_v2 = vld [vmem:[%s268_s1 + $0x8] sm:$0xff]  }
   0x2   :  { %203 = vmatprep.subr.bf16.mxu1 %v215_v0  ;;  %205 = vmatprep.mubr.msk.bf16.mxu1 %vm216_vm0, %v215_v0  ;;  %v213_v3 = vld [vmem:[%s269_s0] sm:$0xff]  }
   0x3   :  { %196 = vmatpush3.bf16.msra.mxu0 %v211_v1  ;;  %v214_v4 = vld [vmem:[%s270_s3] sm:$0xff]  }
   0x4   :  { %197 = vmatprep.subr.bf16.mxu0 %v215_v0  ;;  %204 = vmatpush3.bf16.msra.mxu1 %v214_v4  ;;  %v173_v5 = vld [vmem:[%s271_s2] ss:$0 sm:$0xff] }
   0x5   :  { %v178_v15 = vld [vmem:[%s272_s4] ss:$0 sm:$0xff] }
   0x7   :  { %198 = vmatpush3.bf16.msra.mxu0 %v212_v2 }
   0xa   :  { %200 = vmatmul.mubr.msk.bf16.vlgmr.msra.gmra.mrb[0].mxu0 %vm51_vm1, %v213_v3 }
  0xdd   :  { %v89_v6 = vpop.f32.mrb[0].mxu0 }
  0xde   :  { %v90_v7 = vadd.f32 %v173_v5, %v89_v6  ;;  %v201_v8 = vpop.f32.mrb[1].mxu0 }
  0xdf   :  { %v92_v9 = vpop.f32.mrb[2].mxu0 }
  0xe0   :  { %v93_v10 = vadd.f32 %v173_v5, %v92_v9  ;;  %v202_v11 = vpop.f32.mrb[3].mxu0  ;;  %v96_v12 = vmax.f32 %v90_v7, 0.0 }
  0xe2   :  { %v97_v13 = vmax.f32 %v93_v10, 0.0 }
  0xe4   :  { %v98_v14 = vpack.c.bf16 %v97_v13, %v96_v12 }
  0xe6   :  { %206 = vmatmul.mubr.msk.bf16.vlgmr.msra.gmra.mrb[0].mxu1 %vm114_vm2, %v98_v14 }
 0x1b9   :  { %v152_v16 = vpop.f32.mrb[0].mxu1 }
 0x1ba   :  { %v207_v17 = vpop.f32.mrb[1].mxu1  ;;  %v153_v19 = vadd.f32 %v178_v15, %v152_v16 }
 0x1bb   :  { %v155_v18 = vpop.f32.mrb[2].mxu1 }
 0x1bc   :  { %v156_v20 = vadd.f32 %v178_v15, %v155_v18  ;;  %v208_v21 = vpop.f32.mrb[3].mxu1 }
 0x1be   :  { %v188_v22 = vpack.c.bf16 %v156_v20, %v153_v19 }
 0x1c0   :  { %189 = vst [vmem:[%s273_s5] sm:$0xff] %v188_v22  }

</bundles_post_ra>
